<compile_context>
chip_gen: v7x
topology: tpu7x:2x2x1
jax: 0.10.0
libtpu: 0.0.40
codegen_flags: <defaults>
</compile_context>

<pallas_src>
import functools

import jax
import jax.numpy as jnp
from jax.experimental import pallas as pl
from jax.experimental.pallas import tpu as pltpu


def _sfusion_kernel(scores_ref, value_ref, out_ref, *, H):
    # scores_ref: (H, TL, S), value_ref: (H, S, D), out_ref: (TL, H*D)
    heads = [
        jnp.dot(scores_ref[h], value_ref[h],
                preferred_element_type=jnp.float32)
        for h in range(H)
    ]
    # Concatenate along lanes -> one full-width, lane-dense store.
    out_ref[...] = jnp.concatenate(heads, axis=-1).astype(out_ref.dtype)


def _sfusion_dropout_kernel(scores_ref, mask_ref, value_ref, out_ref, *,
                            H, scale):
    # scores_ref/mask_ref: (H, TL, S), value_ref: (H, S, D), out_ref: (TL, H*D)
    heads = [
        jnp.dot(scores_ref[h] * mask_ref[h], value_ref[h],
                preferred_element_type=jnp.float32)
        for h in range(H)
    ]
    # Dropout's 1/(1-p) rescale commutes with the matmul; apply it to the
    # small (TL, H*D) result instead of the (TL, S)-sized scores.
    out = jnp.concatenate(heads, axis=-1) * jnp.float32(scale)
    out_ref[...] = out.astype(out_ref.dtype)


def _choose_l_tile(L, S, H, itemsize, n_score_like):
    """Pick an L tile so double-buffered score-like tiles stay ~16 MiB."""
    budget = 16 * 1024 * 1024
    denom = max(1, 2 * n_score_like * H * S * itemsize)  # 2x = double buffer
    tl = budget // denom
    if tl >= L:
        return L
    return max(8, (tl // 8) * 8)


def sfusion(value, attentions, scores, *, attn_dropout=0.0, training=False,
            rng=None):
    """Pallas implementation of SFusion.forward(value, attentions, scores)."""
    # `attentions` is unused in the PyTorch forward; kept for signature parity.
    del attentions
    B, H, L, S = scores.shape
    Bv, Hv, S2, D = value.shape
    assert (B, H, S) == (Bv, Hv, S2)

    out_dtype = value.dtype
    p = float(attn_dropout)
    use_dropout = training and p > 0.0
    if use_dropout and p >= 1.0:
        # nn.Dropout(p=1) zeroes everything (avoid the 1/(1-p) singularity).
        return jnp.zeros((B, L, H * D), out_dtype)

    itemsize = jnp.dtype(scores.dtype).itemsize
    TL = _choose_l_tile(L, S, H, itemsize, 2 if use_dropout else 1)
    n_lt = pl.cdiv(L, TL)

    scores_spec = pl.BlockSpec((pl.Squeezed(), H, TL, S),
                               lambda b, l: (b, 0, l, 0))
    value_spec = pl.BlockSpec((pl.Squeezed(), H, S, D),
                              lambda b, l: (b, 0, 0, 0))
    out_spec = pl.BlockSpec((pl.Squeezed(), TL, H * D),
                            lambda b, l: (b, l, 0))
    out_shape = jax.ShapeDtypeStruct((B, L, H * D), out_dtype)
    cparams = pltpu.CompilerParams(
        dimension_semantics=("parallel", "parallel"),
        vmem_limit_bytes=48 * 1024 * 1024,
    )

    if use_dropout:
        if rng is None:
            rng = jax.random.PRNGKey(0)
        # TODO(synk): dropout mask is generated with jax.random in the wrapper
        # (in-kernel pltpu.prng_* has no CPU/interpret lowering); mask-apply,
        # matmul and rescale are still fused inside the Pallas kernel.
        mask = jax.random.bernoulli(rng, 1.0 - p,
                                    scores.shape).astype(scores.dtype)
        kernel = functools.partial(_sfusion_dropout_kernel, H=H,
                                   scale=float(1.0 / (1.0 - p)))
        return pl.pallas_call(
            kernel,
            out_shape=out_shape,
            grid=(B, n_lt),
            in_specs=[scores_spec, scores_spec, value_spec],
            out_specs=out_spec,
            compiler_params=cparams,
        )(scores, mask, value)

    # Eval mode: nn.Dropout is the identity.
    kernel = functools.partial(_sfusion_kernel, H=H)
    return pl.pallas_call(
        kernel,
        out_shape=out_shape,
        grid=(B, n_lt),
        in_specs=[scores_spec, value_spec],
        out_specs=out_spec,
        compiler_params=cparams,
    )(scores, value)


if __name__ == "__main__":
    # Small shapes consistent with the forward: B=2 batch, H=4 heads,
    # L=8 query positions, S=8 key positions, D=32 head dim.
    B, H, L, S, D = 2, 4, 8, 8, 32
    key = jax.random.PRNGKey(0)
    k1, k2, k3, k4 = jax.random.split(key, 4)
    value = jax.random.normal(k1, (B, H, S, D), dtype=jnp.float32)
    scores = jax.random.normal(k2, (B, H, L, S), dtype=jnp.float32)
    # `attentions` is accepted but unused by the module's forward.
    attentions = jax.random.normal(k3, (B, H, L, S), dtype=jnp.float32)

    # --- Inference path (dropout = identity), matching module.eval(). -------
    out = sfusion(value, attentions, scores, attn_dropout=0.1, training=False)
    out = jax.block_until_ready(out)
    ref = jnp.einsum("bhls,bhsd->bhld", scores, value)
    ref = jnp.transpose(ref, (0, 2, 1, 3)).reshape(B, L, H * D)
    assert out.shape == (B, L, H * D)
    # Tolerance covers MXU (bf16-pass) f32 matmul precision on real TPUs.
    assert jnp.allclose(out, ref, atol=1e-2, rtol=1e-2)

    # --- Training path with dropout p>0 (deterministic mask from k4). -------
    p = 0.1
    out_tr = sfusion(value, attentions, scores, attn_dropout=p,
                     training=True, rng=k4)
    out_tr = jax.block_until_ready(out_tr)
    keep = jax.random.bernoulli(k4, 1.0 - p, scores.shape).astype(scores.dtype)
    ref_tr = jnp.einsum("bhls,bhsd->bhld", scores * keep, value) / (1.0 - p)
    ref_tr = jnp.transpose(ref_tr, (0, 2, 1, 3)).reshape(B, L, H * D)
    assert out_tr.shape == (B, L, H * D)
    assert jnp.allclose(out_tr, ref_tr, atol=1e-2, rtol=1e-2)

    print("KERNEL_OK")
</pallas_src>

<mosaic_0001>
module attributes {stable_mosaic.version = 11 : i64} {
  func.func @_sfusion_kernel(%arg0: i32, %arg1: i32, %arg2: memref<1x4x8x8xf32, #tpu.memory_space<vmem>>, %arg3: memref<1x4x8x32xf32, #tpu.memory_space<vmem>>, %arg4: memref<1x8x128xf32, #tpu.memory_space<vmem>>) attributes {dimension_semantics = [#tpu.dimension_semantics<parallel>, #tpu.dimension_semantics<parallel>], iteration_bounds = array<i64: 2, 1>, scalar_prefetch = 0 : i64, scratch_operands = 0 : i64, tpu.core_type = #tpu.core_type<tc>, window_params = [{transform_indices = @transform_0, window_bounds = array<i64: 1, 4, 8, 8>}, {transform_indices = @transform_1, window_bounds = array<i64: 1, 4, 8, 32>}, {transform_indices = @transform_2, window_bounds = array<i64: 1, 8, 128>}]} {
    %c0 = arith.constant 0 : index
    %c0_0 = arith.constant 0 : index
    %c0_1 = arith.constant 0 : index
    %c0_2 = arith.constant 0 : index
    %0 = vector.load %arg2[%c0, %c0_0, %c0_1, %c0_2] : memref<1x4x8x8xf32, #tpu.memory_space<vmem>>, vector<1x1x8x8xf32>
    %1 = vector.shape_cast %0 : vector<1x1x8x8xf32> to vector<8x8xf32>
    %c0_3 = arith.constant 0 : index
    %c0_4 = arith.constant 0 : index
    %c0_5 = arith.constant 0 : index
    %c0_6 = arith.constant 0 : index
    %2 = vector.load %arg3[%c0_3, %c0_4, %c0_5, %c0_6] : memref<1x4x8x32xf32, #tpu.memory_space<vmem>>, vector<1x1x8x32xf32>
    %3 = vector.shape_cast %2 : vector<1x1x8x32xf32> to vector<8x32xf32>
    %cst = arith.constant dense<0.000000e+00> : vector<8x32xf32>
    %4 = tpu.matmul %1, %3, %cst {dimension_numbers = #tpu.dot_dimension_numbers<[1], [0], [0], [1], [0, 0, 1, 1], [], []>} : vector<8x8xf32>, vector<8x32xf32>, vector<8x32xf32> -> vector<8x32xf32>
    %c0_7 = arith.constant 0 : index
    %c1 = arith.constant 1 : index
    %c0_8 = arith.constant 0 : index
    %c0_9 = arith.constant 0 : index
    %5 = vector.load %arg2[%c0_7, %c1, %c0_8, %c0_9] : memref<1x4x8x8xf32, #tpu.memory_space<vmem>>, vector<1x1x8x8xf32>
    %6 = vector.shape_cast %5 : vector<1x1x8x8xf32> to vector<8x8xf32>
    %c0_10 = arith.constant 0 : index
    %c1_11 = arith.constant 1 : index
    %c0_12 = arith.constant 0 : index
    %c0_13 = arith.constant 0 : index
    %7 = vector.load %arg3[%c0_10, %c1_11, %c0_12, %c0_13] : memref<1x4x8x32xf32, #tpu.memory_space<vmem>>, vector<1x1x8x32xf32>
    %8 = vector.shape_cast %7 : vector<1x1x8x32xf32> to vector<8x32xf32>
    %cst_14 = arith.constant dense<0.000000e+00> : vector<8x32xf32>
    %9 = tpu.matmul %6, %8, %cst_14 {dimension_numbers = #tpu.dot_dimension_numbers<[1], [0], [0], [1], [0, 0, 1, 1], [], []>} : vector<8x8xf32>, vector<8x32xf32>, vector<8x32xf32> -> vector<8x32xf32>
    %c0_15 = arith.constant 0 : index
    %c2 = arith.constant 2 : index
    %c0_16 = arith.constant 0 : index
    %c0_17 = arith.constant 0 : index
    %10 = vector.load %arg2[%c0_15, %c2, %c0_16, %c0_17] : memref<1x4x8x8xf32, #tpu.memory_space<vmem>>, vector<1x1x8x8xf32>
    %11 = vector.shape_cast %10 : vector<1x1x8x8xf32> to vector<8x8xf32>
    %c0_18 = arith.constant 0 : index
    %c2_19 = arith.constant 2 : index
    %c0_20 = arith.constant 0 : index
    %c0_21 = arith.constant 0 : index
    %12 = vector.load %arg3[%c0_18, %c2_19, %c0_20, %c0_21] : memref<1x4x8x32xf32, #tpu.memory_space<vmem>>, vector<1x1x8x32xf32>
    %13 = vector.shape_cast %12 : vector<1x1x8x32xf32> to vector<8x32xf32>
    %cst_22 = arith.constant dense<0.000000e+00> : vector<8x32xf32>
    %14 = tpu.matmul %11, %13, %cst_22 {dimension_numbers = #tpu.dot_dimension_numbers<[1], [0], [0], [1], [0, 0, 1, 1], [], []>} : vector<8x8xf32>, vector<8x32xf32>, vector<8x32xf32> -> vector<8x32xf32>
    %c0_23 = arith.constant 0 : index
    %c3 = arith.constant 3 : index
    %c0_24 = arith.constant 0 : index
    %c0_25 = arith.constant 0 : index
    %15 = vector.load %arg2[%c0_23, %c3, %c0_24, %c0_25] : memref<1x4x8x8xf32, #tpu.memory_space<vmem>>, vector<1x1x8x8xf32>
    %16 = vector.shape_cast %15 : vector<1x1x8x8xf32> to vector<8x8xf32>
    %c0_26 = arith.constant 0 : index
    %c3_27 = arith.constant 3 : index
    %c0_28 = arith.constant 0 : index
    %c0_29 = arith.constant 0 : index
    %17 = vector.load %arg3[%c0_26, %c3_27, %c0_28, %c0_29] : memref<1x4x8x32xf32, #tpu.memory_space<vmem>>, vector<1x1x8x32xf32>
    %18 = vector.shape_cast %17 : vector<1x1x8x32xf32> to vector<8x32xf32>
    %cst_30 = arith.constant dense<0.000000e+00> : vector<8x32xf32>
    %19 = tpu.matmul %16, %18, %cst_30 {dimension_numbers = #tpu.dot_dimension_numbers<[1], [0], [0], [1], [0, 0, 1, 1], [], []>} : vector<8x8xf32>, vector<8x32xf32>, vector<8x32xf32> -> vector<8x32xf32>
    %20 = tpu.concatenate %4, %9, %14, %19 in 1 : vector<8x32xf32>, vector<8x32xf32>, vector<8x32xf32>, vector<8x32xf32> -> vector<8x128xf32>
    %c0_31 = arith.constant 0 : index
    %c0_32 = arith.constant 0 : index
    %c0_33 = arith.constant 0 : index
    %21 = vector.load %arg4[%c0_31, %c0_32, %c0_33] : memref<1x8x128xf32, #tpu.memory_space<vmem>>, vector<1x8x128xf32>
    %22 = vector.shape_cast %21 : vector<1x8x128xf32> to vector<8x128xf32>
    %23 = vector.shape_cast %20 : vector<8x128xf32> to vector<1x8x128xf32>
    tpu.vector_store %arg4[%c0_31, %c0_32, %c0_33], %23 {strides = array<i32>} : memref<1x8x128xf32, #tpu.memory_space<vmem>>, vector<1x8x128xf32>,
    return
  }
  func.func @transform_0(%arg0: i32, %arg1: i32) -> (i32, i32, i32, i32) {
    %c0_i32 = arith.constant 0 : i32
    %c0_i32_0 = arith.constant 0 : i32
    %c0_i32_1 = arith.constant 0 : i32
    return %arg0, %c0_i32, %arg1, %c0_i32_0 : i32, i32, i32, i32
  }
  func.func @transform_1(%arg0: i32, %arg1: i32) -> (i32, i32, i32, i32) {
    %c0_i32 = arith.constant 0 : i32
    %c0_i32_0 = arith.constant 0 : i32
    %c0_i32_1 = arith.constant 0 : i32
    %c0_i32_2 = arith.constant 0 : i32
    return %arg0, %c0_i32, %c0_i32_0, %c0_i32_1 : i32, i32, i32, i32
  }
  func.func @transform_2(%arg0: i32, %arg1: i32) -> (i32, i32, i32) {
    %c0_i32 = arith.constant 0 : i32
    %c0_i32_0 = arith.constant 0 : i32
    return %arg0, %arg1, %c0_i32 : i32, i32, i32
  }
}

</mosaic_0001>

<bundles_post_ra>
// kernel: tpu_custom_call.1
= control target key start
LH: loop header
LB: loop body
LE: loop exit
PB: predicated region body
PF: predicated region fallthrough
CT: control target
= control target key end

     0   :  { %7 = vsyncpa [#allocation3], 0  ;;  %s1212_s0 = inlined_call_operand.hbm [shape: f32[2,4,8,8], index: 0, kind: input, shape index: {}]   ;;  %s1213_s1 = inlined_call_operand.hbm [shape: f32[2,4,8,32], index: 1, kind: input, shape index: {}]   ;;  %s1214_s2 = inlined_call_operand.hbm [shape: f32[2,8,128], index: 2, kind: output, shape index: {}]  }
   0x1   :  { %9 = vsyncpa [#allocation3 + $0x1], 0 }
   0x2   :  { %10 = vsyncpa [#allocation6], 0 }
   0x3   :  { %12 = vsyncpa [#allocation6 + $0x1], 0 }
   0x4   :  { %13 = vsyncpa [#allocation4], 0 }
   0x5   :  { %15 = vsyncpa [#allocation4 + $0x1], 0  ;;  %s969_s9 = smov 0   ;;  %s971_s10 = smov 0  }
   0x6   :  { %s973_s11 = smov 0   ;;  %s975_s12 = smov 0  }
   0x7   :  { %s977_s13 = smov 0   ;;  %s979_s14 = smov 0  }
   0x8 LB: > { %s664_s15 = sadd.s32 4294967295, %s942_s14   ;;  %s665_s16 = sadd.s32 4294967294, %s942_s14   ;;  %s942_s14 = sphi %s979_s14, %s21_s14   ;;  %s938_s13 = sphi %s977_s13, %s1232_s13   ;;  %s934_s12 = sphi %s975_s12, %s1231_s12   ;;  %s930_s11 = sphi %s973_s11, %s1230_s11   ;;  %s926_s10 = sphi %s971_s10, %s1229_s10   ;;  %s922_s9 = sphi %s969_s9, %s1228_s9  }
   0x9   : > { %s33_s17 = sadd.s32 1, %s938_s13  ;;  %s42_s18 = sadd.s32 1, %s930_s11 }
   0xa   : > { %p35_p0 = scmp.ge.s32.totalorder %s33_s17, 2  ;;  %p49_p1 = scmp.ne.s32.totalorder %s930_s11, %s926_s10 }
   0xb   : > { %p50_p2 = scmp.eq.s32.totalorder %s942_s14, 0  ;;  %p55_p3 = scmp.ne.s32.totalorder %s926_s10, %s922_s9 }
   0xc   : > { %s1234_s17 = smov (%p35_p0, %s33_s17), 0  ;;  %p56_p5 = scmp.eq.s32.totalorder %s664_s15, 0 }
   0xd   : > { %p1010_p4 = por %p50_p2, %p49_p1  ;;  %s37_s20 = ssub.s32 %s938_s13, %s1234_s17 }
   0xe   : > { %p107_p6 = scmp.eq.s32.totalorder %s664_s15, 1  ;;  %p40_p7 = scmp.eq.s32.totalorder %s37_s20, 0 }
   0xf   : > { %p1016_p8 = por %p56_p5, %p55_p3  ;;  %p113_p10 = scmp.eq.s32.totalorder %s665_s16, 1 }
  0x10   : > { %p1020_p9 = por %p107_p6, %p49_p1  ;;  %p739_p13 = scmp.lt.s32.totalorder %s942_s14, 2 }
  0x11   : > { %s1218_s21 = scalar_select %p1016_p8, 1, 0 }
  0x12   : > { %s1219_s22 = scalar_select %p1020_p9, 1, 0 }
  0x13   : > { %s1025_s23 = scalar_select %p40_p7, %s930_s11, %s42_s18  }
  0x14   : > { %p1027_p11 = por %p113_p10, %p55_p3  ;;  %s1034_s25 = sand.u32 1, %s930_s11  }
  0x15   : > { %s668_s26 = sshll.u32 %s1034_s25, 5  ;;  %s692_s27 = sshll.u32 %s938_s13, 9 }
  0x16   : > { %s1220_s24 = scalar_select %p1027_p11, 1, 0 }
  0x17   : > { %s1043_s30 = scalar_lea.hbm %s1212_s0, %s692_s27  ;;  %s137_s3 = scalar_lea.vmem [#allocation2], %s668_s26 }
  0x18   : > { %s145_s4 = sshll.u32 %s137_s3, 4  ;;  %p1051_p0 = pnand %p739_p13, %p1010_p4  ;;  %s1047_s4 = int_to_ptr.vmem [resolvable:$true] %s145_s4 }
  0x19   : > { %s134_s6 = scalar_lea.sflag [#allocation3], %s1034_s25  ;;  %s796_s7 = scalar_lea.hbm %s1043_s30, 512 }
  0x1a   : > { %p797_p2 = scmp.ne.s32.totalorder %s1043_s30, %s796_s7  ;;  %p798_p3 = pneg %p1051_p0 }
  0x1b   : > { %s801_s16 = scalar_lea.hbm %s1212_s0, 1024  ;;  %p802_p4 = scmp.lt.u32.totalorder %s1043_s30, %s1212_s0 }
  0x1c   : > { %p799_p5 = pnand %p798_p3, %p797_p2  ;;  %p803_p7 = scmp.lt.u32.totalorder %s801_s16, %s796_s7 }
  0x1d   : > { %p805_p13 = scmp.lt.u32.totalorder %s796_s7, %s1043_s30 }
  0x1e   : > { %p800_p6 = pneg %p799_p5  ;;  %p804_p10 = por %p803_p7, %p802_p4 }
  0x20   : > { %p806_p12 = por %p805_p13, %p804_p10 }
  0x22   : > { %p807_p1 = pnand %p806_p12, %p800_p6 }
  0x24   : > { %810 = shalt.err (!%p807_p1)
}
  0x25   : > { %s811_s20 = scalar_lea.vmem %s1047_s4, 512  ;;  %s944_s28 = smov [#allocation2]  }
  0x26   : > { %p812_p2 = scmp.ne.s32.totalorder %s1047_s4, %s811_s20  ;;  %s816_s29 = sshll.u32 %s944_s28, 4  ;;  %s817_s29 = int_to_ptr.vmem [resolvable:$false] %s816_s29 }
  0x27   : > { %s818_s3 = scalar_lea.vmem %s817_s29, 1024  ;;  %p819_p9 = scmp.lt.s32.totalorder %s1047_s4, %s817_s29 }
  0x28   : > { %p814_p5 = pnand %p812_p2, %p798_p3  ;;  %p820_p4 = scmp.lt.s32.totalorder %s818_s3, %s811_s20 }
  0x2a   : > { %p815_p11 = pneg %p814_p5  ;;  %p821_p7 = por %p820_p4, %p819_p9 }
  0x2c   : > { %p822_p10 = pnand %p821_p7, %p815_p11 }
  0x2e   : > { %825 = shalt.err (!%p822_p10)
}
  0x2f   : > { %s945_s7 = smov 128   ;;  %s946_s8 = smov 8  }
  0x30   : > { %731 = dma.hbm_to_vmem [thread:$0]  (!%p1051_p0), %s1043_s30, 512, %s1047_s4, %s134_s6, %s945_s7, %s945_s7, %s946_s8  }
  0x31   : > { %p174_p9 = scmp.lt.s32.totalorder %s942_s14, 3  ;;  %s1093_s18 = scalar_lea.hbm %s1213_s1, %s692_s27 }
  0x32   : > { %p1222_p11 = scmp.ge.s32.totalorder %s942_s14, 1  ;;  %s159_s20 = scalar_lea.vmem [#allocation5], %s668_s26 }
  0x33   : > { %s166_s28 = sshll.u32 %s159_s20, 4  ;;  %s156_s30 = scalar_lea.sflag [#allocation6], %s1034_s25  ;;  %s1103_s28 = int_to_ptr.vmem [resolvable:$true] %s166_s28 }
  0x34   : > { %p1097_p12 = pnand %p1222_p11, %p174_p9  ;;  %s826_s4 = scalar_lea.hbm %s1093_s18, 512 }
  0x35   : > { %p827_p1 = scmp.ne.s32.totalorder %s1093_s18, %s826_s4  ;;  %s831_s29 = scalar_lea.hbm %s1213_s1, 1024 }
  0x36   : > { %p832_p2 = scmp.lt.u32.totalorder %s1093_s18, %s1213_s1  ;;  %p833_p5 = scmp.lt.u32.totalorder %s831_s29, %s826_s4 }
  0x37   : > { %p829_p6 = pnand %p827_p1, %p798_p3  ;;  %p835_p7 = scmp.lt.u32.totalorder %s826_s4, %s1093_s18 }
  0x38   : > { %p834_p4 = por %p833_p5, %p832_p2 }
  0x39   : > { %p830_p13 = pneg %p829_p6 }
  0x3a   : > { %p836_p10 = por %p835_p7, %p834_p4 }
  0x3c   : > { %p837_p9 = pnand %p836_p10, %p830_p13 }
  0x3e   : > { %840 = shalt.err (!%p837_p9)
}
  0x3f   : > { %s841_s26 = scalar_lea.vmem %s1103_s28, 512  ;;  %s947_s16 = smov [#allocation5]  }
  0x40   : > { %p842_p11 = scmp.ne.s32.totalorder %s1103_s28, %s841_s26  ;;  %s846_s20 = sshll.u32 %s947_s16, 4  ;;  %s847_s20 = int_to_ptr.vmem [resolvable:$false] %s846_s20 }
  0x41   : > { %s848_s27 = scalar_lea.vmem %s847_s20, 1024  ;;  %p849_p8 = scmp.lt.s32.totalorder %s1103_s28, %s847_s20 }
  0x42   : > { %p844_p1 = pnand %p842_p11, %p798_p3  ;;  %p850_p2 = scmp.lt.s32.totalorder %s848_s27, %s841_s26 }
  0x44   : > { %p845_p6 = pneg %p844_p1  ;;  %p851_p5 = por %p850_p2, %p849_p8 }
  0x46   : > { %p852_p4 = pnand %p851_p5, %p845_p6 }
  0x48   : > { %855 = shalt.err (!%p852_p4)
}
  0x49   : > { %734 = dma.hbm_to_vmem [thread:$0]  (!%p1051_p0), %s1093_s18, 512, %s1103_s28, %s156_s30, %s945_s7, %s945_s7, %s946_s8  }
  0x4a   : > { %178 = sbr.rel (%p1097_p12) target bundleno = 435 (0x1b3), region = 28  ;;  %s1137_s4 = sand.u32 (!%p1097_p12), 1, %s926_s10  }
  0x4b   : > { %s675_s6 = sshll.u32 (!%p1097_p12), %s1137_s4, 5  ;;  %s181_s29 = scalar_lea.sflag (!%p1097_p12), [#allocation3], %s1137_s4 }
  0x4c   : > { %s184_s5 = scalar_lea.vmem (!%p1097_p12), [#allocation2], %s675_s6  ;;  %p1224_p8 = scmp.ne.s32.totalorder (!%p1097_p12), %s1218_s21, 0 }
  0x51   : > { %909 = dma.done.wait (%p1224_p8), %s181_s29, 512  }
  0x52   : > { %911 = vsyncadd (%p1224_p8), %s181_s29, 4294966784  ;;  %s190_s25 = scalar_lea.sflag [#allocation6], %s1137_s4  ;;  %s193_s7 = scalar_lea.vmem [#allocation5], %s675_s6 }
  0x53   : > { %913 = dma.done.wait (%p1224_p8), %s190_s25, 512  }
  0x54   : > { %915 = vsyncadd (%p1224_p8), %s190_s25, 4294966784  ;;  %v948_v0 = vmov 0.0   ;;  %vm949_vm0 = vmmov 0   ;;  %vm221_vm1 = vcmask 64512   ;;  %v220_v1 = vld [vmem:[%s193_s7] sm:$0xff]  ;;  %v680_v2 = vld [vmem:[%s193_s7 + $0x8] sm:$0xff] }
  0x55   : > { %702 = vmatprep.subr.mxu0 %v948_v0  ;;  %707 = vmatprep.subr.mxu1 %v948_v0  ;;  %v219_v3 = vld [vmem:[%s184_s5] sm:$0xff]  ;;  %v679_v4 = vld [vmem:[%s184_s5 + $0x8] sm:$0xff]  ;;  %v683_v5 = vld [vmem:[%s193_s7 + $0x10] sm:$0xff]  ;;  %s950_s21 = smov 32   ;;  %s951_s8 = smov 64   ;;  %vm538_vm2 = vcmask 261120  }
  0x56   : > { %704 = vmatprep.mubr.msk.f32.mxu0 %vm949_vm0, %v948_v0  ;;  %709 = vmatprep.mubr.msk.f32.mxu1 %vm949_vm0, %v948_v0  ;;  %v686_v6 = vld [vmem:[%s193_s7 + $0x18] sm:$0xff]  ;;  %v682_v7 = vld [vmem:[%s184_s5 + $0x10] sm:$0xff]  ;;  %s952_s18 = smov 96   ;;  %s677_s19 = sshll.u32 %s1137_s4, 3  ;;  %vm540_vm3 = vcmask 523264   ;;  %vm542_vm4 = vcmask 785408  }
  0x57   : > { %703 = vmatpush3.msra.mxu0 %v220_v1  ;;  %708 = vmatpush3.msra.mxu1 %v680_v2  ;;  %v685_v8 = vld [vmem:[%s184_s5 + $0x18] sm:$0xff]  ;;  %s689_s28 = sshll.u32 %s934_s12, 7  ;;  %s218_s30 = scalar_lea.vmem [#allocation7], %s677_s19 }
  0x58   : > { %705 = vmatmul.mubr.msk.f32.vlgmr.msra.gmra.mrb[0].mxu0 %vm221_vm1, %v219_v3  ;;  %710 = vmatmul.mubr.msk.f32.vlgmr.msra.gmra.mrb[0].mxu1 %vm221_vm1, %v679_v4  ;;  %s560_s3 = sshll.u32 %s218_s30, 4  ;;  %s1163_s16 = scalar_lea.hbm %s1214_s2, %s689_s28  ;;  %s1165_s3 = int_to_ptr.vmem [resolvable:$true] %s560_s3 }
  0x59   : > { %712 = vmatprep.subr.mxu0 %v948_v0  ;;  %717 = vmatprep.subr.mxu1 %v948_v0  ;;  %s546_s12 = scalar_lea.sflag [#allocation4], %s1137_s4  ;;  %s856_s20 = scalar_lea.vmem %s1165_s3, 128 }
  0x5a   : > { %713 = vmatpush3.msra.mxu0 %v683_v5  ;;  %718 = vmatpush3.msra.mxu1 %v686_v6  ;;  %p857_p0 = scmp.ne.s32.totalorder %s1165_s3, %s856_s20  ;;  %p1225_p3 = scmp.ne.s32.totalorder %s1219_s22, 0 }
  0x5b   : > { %714 = vmatprep.mubr.msk.f32.mxu0 %vm949_vm0, %v948_v0  ;;  %719 = vmatprep.mubr.msk.f32.mxu1 %vm949_vm0, %v948_v0  ;;  %s953_s27 = smov [#allocation7]  }
  0x5c   : > { %715 = vmatmul.mubr.msk.f32.vlgmr.msra.gmra.mrb[2].mxu0 %vm221_vm1, %v682_v7  ;;  %720 = vmatmul.mubr.msk.f32.vlgmr.msra.gmra.mrb[2].mxu1 %vm221_vm1, %v685_v8  ;;  %p858_p12 = pnand %p857_p0, %p1225_p3  ;;  %s860_s6 = sshll.u32 %s953_s27, 4  ;;  %s861_s6 = int_to_ptr.vmem [resolvable:$false] %s860_s6 }
  0x5d   : > { %s862_s29 = scalar_lea.vmem %s861_s6, 256  ;;  %p863_p7 = scmp.lt.s32.totalorder %s1165_s3, %s861_s6 }
  0x5e   : > { %p859_p13 = pneg %p858_p12  ;;  %p864_p10 = scmp.lt.s32.totalorder %s862_s29, %s856_s20 }
  0x60   : > { %p865_p9 = por %p864_p10, %p863_p7 }
  0x62   : > { %p866_p11 = pnand %p865_p9, %p859_p13 }
 0x12b   : > { %v291_v9 = vpop.f32.mrb[0].mxu0  ;;  %v368_v10 = vpop.f32.mrb[0].mxu1 }
 0x12c   : > { %527 = vrot.lane.b32.xlu0 %v368_v10, %s950_s21  ;;  %v706_v11 = vpop.f32.mrb[1].mxu0  ;;  %v711_v12 = vpop.f32.mrb[1].mxu1 }
 0x12f   : > { %v445_v13 = vpop.f32.mrb[2].mxu0  ;;  %v522_v14 = vpop.f32.mrb[2].mxu1 }
 0x130   : > { %531 = vrot.lane.b32.xlu0 %v445_v13, %s951_s8  ;;  %v716_v15 = vpop.f32.mrb[3].mxu0  ;;  %535 = vrot.lane.b32.xlu1 %v522_v14, %s952_s18  ;;  %v721_v16 = vpop.f32.mrb[3].mxu1 }
 0x19e   : > { %v528_v17 = vpop.permute.xlu0 %527 }
 0x19f   : > { %v539_v18 = vsel %vm538_vm2, %v291_v9, %v528_v17 }
 0x1a2   : > { %v532_v19 = vpop.permute.xlu0 %531  ;;  %v536_v20 = vpop.permute.xlu1 %535 }
 0x1a3   : > { %v541_v21 = vsel %vm540_vm3, %v539_v18, %v532_v19 }
 0x1a4   : > { %v543_v22 = vsel %vm542_vm4, %v541_v21, %v536_v20 }
 0x1a5   : > { %544 = vst [vmem:[%s218_s30] sm:$0xff] %v543_v22 }
 0x1a6   : > { %869 = shalt.err (!%p866_p11)
}
 0x1a7   : > { %s870_s4 = scalar_lea.hbm %s1163_s16, 128  ;;  %s874_s7 = scalar_lea.hbm %s1214_s2, 256 }
 0x1a8   : > { %p871_p1 = scmp.ne.s32.totalorder %s1163_s16, %s870_s4  ;;  %p875_p5 = scmp.lt.u32.totalorder %s1163_s16, %s1214_s2 }
 0x1a9   : > { %p876_p4 = scmp.lt.u32.totalorder %s874_s7, %s870_s4  ;;  %p878_p0 = scmp.lt.u32.totalorder %s870_s4, %s1163_s16 }
 0x1aa   : > { %p872_p6 = pnand %p871_p1, %p1225_p3 }
 0x1ab   : > { %p877_p8 = por %p876_p4, %p875_p5 }
 0x1ac   : > { %p873_p2 = pneg %p872_p6 }
 0x1ad   : > { %p879_p12 = por %p878_p0, %p877_p8 }
 0x1af   : > { %p880_p13 = pnand %p879_p12, %p873_p2 }
 0x1b1   : > { %883 = shalt.err (!%p880_p13)
}
 0x1b2   : > { %726 = dma.vmem_to_hbm [thread:$0]  (%p1225_p3), %s1165_s3, 128, %s1163_s16, %s546_s12  }
 0x1b3 PF: > { %s572_s18 = sand.u32 1, %s922_s9   ;;  %p1226_p7 = scmp.ne.s32.totalorder %s1220_s24, 0 }
 0x1b4   : > { %p1227_p10 = scmp.ge.s32.totalorder %s942_s14, 2  ;;  %s573_s19 = scalar_lea.sflag [#allocation4], %s572_s18 }
 0x1b6   : > { %p736_p9 = pnand %p1227_p10, %p1226_p7 }
 0x1b8   : > { %917 = dma.done.wait (!%p736_p9), %s573_s19, 128  }
 0x1b9   : > { %919 = vsyncadd (!%p736_p9), %s573_s19, 4294967168  ;;  %s21_s14 = sadd.s32 1, %s942_s14   ;;  %s1228_s9 = smov %s926_s10 }
 0x1ba   : > { %p18_p11 = scmp.ge.s32.totalorder %s21_s14, 4   ;;  %s1229_s10 = smov %s930_s11 }
 0x1bb   : > { %s1230_s11 = smov %s1025_s23  ;;  %s1231_s12 = smov %s938_s13 }
 0x1bc   : > { %s1232_s13 = smov %s1234_s17  ;;  %20 = sbr.rel (!%p18_p11) target bundleno = 8 (0x8), region = 92 }
 0x1c3   :  { %578 = vsyncpa [#allocation3], 1 }
 0x1c4   :  { %580 = vsyncpa [#allocation3 + $0x1], 1 }
 0x1c5   :  { %581 = vsyncpa [#allocation6], 1 }
 0x1c6   :  { %583 = vsyncpa [#allocation6 + $0x1], 1 }
 0x1c7   :  { %584 = vsyncpa [#allocation4], 1 }
 0x1c8   :  { %586 = vsyncpa [#allocation4 + $0x1], 1 }

</bundles_post_ra>
